<compile_context>
chip_gen: v5e
topology: v5e:2x2
jax: 0.10.0
libtpu: 0.0.40
codegen_flags: <defaults>
</compile_context>

<pallas_src>
import jax
import jax.numpy as jnp
from jax.experimental import pallas as pl
from jax.experimental.pallas import tpu as pltpu


def _round_up(a: int, b: int) -> int:
    return (a + b - 1) // b * b


def mlp_kernel(x_ref, w1_ref, b1_ref, w2_ref, b2_ref, o_ref):
    # x_ref: (TB, D) VMEM   w1_ref: (D, 64) VMEM (resident)
    # b1_ref: (1, 64) VMEM  w2_ref: (1, 64) VMEM  b2_ref: (1,) SMEM scalar
    x = x_ref[...]
    # Layer 1 on the MXU, f32 accumulate.
    h = jnp.dot(x, w1_ref[...], preferred_element_type=jnp.float32)
    h = jnp.maximum(h + b1_ref[...], 0.0)                     # bias + ReLU (VPU)
    # Layer 2 (64 -> 1): VPU multiply + XLU lane reduction; avoids an N=1
    # MXU matmul that would use 1/128-1/256 of the MXU output width.
    y = jnp.sum(h * w2_ref[...], axis=-1, keepdims=True)      # (TB, 1)
    o_ref[...] = (y + b2_ref[0]).astype(o_ref.dtype)


def simple_model_forward(x, w1, b1, w2, b2, *, block_rows=8192):
    """x: (B, D) f32; w1: (D, 64); b1: (64,); w2: (64, 1); b2: (1,)."""
    B, D = x.shape
    H = w1.shape[1]
    assert w2.shape == (H, 1) and b1.shape == (H,) and b2.shape == (1,)

    # Batch tile: multiple of 8 (f32 sublanes); small batches use one block.
    TB = min(block_rows, _round_up(B, 8))
    B_pad = _round_up(B, TB)
    x_p = x if B_pad == B else jnp.pad(x, ((0, B_pad - B), (0, 0)))

    b1_2d = b1.reshape(1, H)      # broadcastable bias
    w2_row = w2.reshape(1, H)     # second-layer weights as a row vector
    b2_1d = b2.reshape(1)         # scalar, placed in SMEM

    grid = (B_pad // TB,)

    # Advisory cost hint: 2 matmul-ish passes + elementwise; kernel is
    # HBM-bandwidth bound on x.
    flops = 2 * B_pad * D * H + 2 * B_pad * H
    bytes_accessed = 4 * (B_pad * D + B_pad + D * H + 2 * H + 1)

    out = pl.pallas_call(
        mlp_kernel,
        out_shape=jax.ShapeDtypeStruct((B_pad, 1), x.dtype),
        grid_spec=pltpu.PrefetchScalarGridSpec(
            num_scalar_prefetch=0,
            grid=grid,
            in_specs=[
                pl.BlockSpec((TB, D), lambda i: (i, 0)),   # x: streamed/pipelined
                pl.BlockSpec((D, H), lambda i: (0, 0)),    # w1: resident
                pl.BlockSpec((1, H), lambda i: (0, 0)),    # b1: resident
                pl.BlockSpec((1, H), lambda i: (0, 0)),    # w2 row: resident
                pl.BlockSpec(memory_space=pltpu.MemorySpace.SMEM),  # b2 scalar
            ],
            out_specs=pl.BlockSpec((TB, 1), lambda i: (i, 0)),
        ),
        compiler_params=pltpu.CompilerParams(
            dimension_semantics=("parallel",),
        ),
        cost_estimate=pl.CostEstimate(
            flops=flops, transcendentals=0, bytes_accessed=bytes_accessed),
    )(x_p, w1, b1_2d, w2_row, b2_1d)

    return out[:B]


def init_params(key, dim, hidden=64, out=1):
    # Deterministic init mimicking PyTorch nn.Linear default:
    # U(-1/sqrt(fan_in), 1/sqrt(fan_in)) for both weight and bias.
    k1, k2, k3, k4 = jax.random.split(key, 4)
    bound1 = 1.0 / jnp.sqrt(dim)
    bound2 = 1.0 / jnp.sqrt(hidden)
    w1 = jax.random.uniform(k1, (dim, hidden), jnp.float32, -bound1, bound1)
    b1 = jax.random.uniform(k2, (hidden,), jnp.float32, -bound1, bound1)
    w2 = jax.random.uniform(k3, (hidden, out), jnp.float32, -bound2, bound2)
    b2 = jax.random.uniform(k4, (out,), jnp.float32, -bound2, bound2)
    return w1, b1, w2, b2


if __name__ == "__main__":
    key = jax.random.PRNGKey(0)
    k_x, k_p, k_x2 = jax.random.split(key, 3)

    # Small shapes consistent with the module.
    batch, dim = 8, 32
    x = jax.random.normal(k_x, (batch, dim), jnp.float32)
    w1, b1, w2, b2 = init_params(k_p, dim)

    out = simple_model_forward(x, w1, b1, w2, b2)
    out = jax.block_until_ready(out)

    ref = jnp.maximum(x @ w1 + b1, 0.0) @ w2 + b2
    assert out.shape == (batch, 1)
    assert jnp.allclose(out, ref, atol=1e-5, rtol=1e-5)

    # Exercise the multi-tile + ragged-tail path (B not divisible by TB).
    batch2 = 300
    x2 = jax.random.normal(k_x2, (batch2, dim), jnp.float32)
    out2 = simple_model_forward(x2, w1, b1, w2, b2, block_rows=128)
    out2 = jax.block_until_ready(out2)
    ref2 = jnp.maximum(x2 @ w1 + b1, 0.0) @ w2 + b2
    assert out2.shape == (batch2, 1)
    assert jnp.allclose(out2, ref2, atol=1e-5, rtol=1e-5)

    print("KERNEL_OK")
</pallas_src>

<mosaic_0001>
module attributes {stable_mosaic.version = 11 : i64} {
  func.func @mlp_kernel(%arg0: i32, %arg1: memref<8x32xf32, #tpu.memory_space<vmem>>, %arg2: memref<32x64xf32, #tpu.memory_space<vmem>>, %arg3: memref<1x64xf32, #tpu.memory_space<vmem>>, %arg4: memref<1x64xf32, #tpu.memory_space<vmem>>, %arg5: memref<1xf32, #tpu.memory_space<smem>>, %arg6: memref<8x1xf32, #tpu.memory_space<vmem>>) attributes {dimension_semantics = [#tpu.dimension_semantics<parallel>], iteration_bounds = array<i64: 1>, scalar_prefetch = 0 : i64, scratch_operands = 0 : i64, tpu.core_type = #tpu.core_type<tc>, window_params = [{transform_indices = @transform_0, window_bounds = array<i64: 8, 32>}, {pipeline_mode = #tpu.pipeline_mode<synchronous>, transform_indices = @transform_1, window_bounds = array<i64: 32, 64>}, {pipeline_mode = #tpu.pipeline_mode<synchronous>, transform_indices = @transform_2, window_bounds = array<i64: 1, 64>}, {pipeline_mode = #tpu.pipeline_mode<synchronous>, transform_indices = @transform_3, window_bounds = array<i64: 1, 64>}, {transform_indices = @transform_4, window_bounds = array<i64: 1>}, {transform_indices = @transform_5, window_bounds = array<i64: 8, 1>}]} {
    %c0 = arith.constant 0 : index
    %c0_0 = arith.constant 0 : index
    %0 = vector.load %arg1[%c0, %c0_0] : memref<8x32xf32, #tpu.memory_space<vmem>>, vector<8x32xf32>
    %c0_1 = arith.constant 0 : index
    %c0_2 = arith.constant 0 : index
    %1 = vector.load %arg2[%c0_1, %c0_2] : memref<32x64xf32, #tpu.memory_space<vmem>>, vector<32x64xf32>
    %cst = arith.constant dense<0.000000e+00> : vector<8x64xf32>
    %2 = tpu.matmul %0, %1, %cst {dimension_numbers = #tpu.dot_dimension_numbers<[1], [0], [0], [1], [0, 0, 1, 1], [], []>} : vector<8x32xf32>, vector<32x64xf32>, vector<8x64xf32> -> vector<8x64xf32>
    %c0_3 = arith.constant 0 : index
    %c0_4 = arith.constant 0 : index
    %3 = vector.load %arg3[%c0_3, %c0_4] : memref<1x64xf32, #tpu.memory_space<vmem>>, vector<1x64xf32>
    %4 = vector.broadcast %3 : vector<1x64xf32> to vector<8x64xf32>
    %5 = arith.addf %2, %4 : vector<8x64xf32>
    %cst_5 = arith.constant 0.000000e+00 : f32
    %6 = vector.broadcast %cst_5 : f32 to vector<8x64xf32>
    %7 = arith.maximumf %5, %6 : vector<8x64xf32>
    %c0_6 = arith.constant 0 : index
    %c0_7 = arith.constant 0 : index
    %8 = vector.load %arg4[%c0_6, %c0_7] : memref<1x64xf32, #tpu.memory_space<vmem>>, vector<1x64xf32>
    %9 = vector.broadcast %8 : vector<1x64xf32> to vector<8x64xf32>
    %10 = arith.mulf %7, %9 : vector<8x64xf32>
    %cst_8 = arith.constant dense<0.000000e+00> : vector<8xf32>
    %11 = vector.multi_reduction <add>, %10, %cst_8 [1] : vector<8x64xf32> to vector<8xf32>
    %12 = vector.shape_cast %11 : vector<8xf32> to vector<8x1xf32>
    %c0_9 = arith.constant 0 : index
    %13 = memref.load %arg5[%c0_9] : memref<1xf32, #tpu.memory_space<smem>>
    %14 = vector.broadcast %13 : f32 to vector<8x1xf32>
    %15 = arith.addf %12, %14 : vector<8x1xf32>
    %c0_10 = arith.constant 0 : index
    %c0_11 = arith.constant 0 : index
    %16 = vector.load %arg6[%c0_10, %c0_11] : memref<8x1xf32, #tpu.memory_space<vmem>>, vector<8x1xf32>
    tpu.vector_store %arg6[%c0_10, %c0_11], %15 {strides = array<i32>} : memref<8x1xf32, #tpu.memory_space<vmem>>, vector<8x1xf32>,
    return
  }
  func.func @transform_0(%arg0: i32) -> (i32, i32) {
    %c0_i32 = arith.constant 0 : i32
    %c0_i32_0 = arith.constant 0 : i32
    return %arg0, %c0_i32 : i32, i32
  }
  func.func @transform_1(%arg0: i32) -> (i32, i32) {
    %c0_i32 = arith.constant 0 : i32
    %c0_i32_0 = arith.constant 0 : i32
    %c0_i32_1 = arith.constant 0 : i32
    return %c0_i32, %c0_i32_0 : i32, i32
  }
  func.func @transform_2(%arg0: i32) -> (i32, i32) {
    %c0_i32 = arith.constant 0 : i32
    %c0_i32_0 = arith.constant 0 : i32
    %c0_i32_1 = arith.constant 0 : i32
    return %c0_i32, %c0_i32_0 : i32, i32
  }
  func.func @transform_3(%arg0: i32) -> (i32, i32) {
    %c0_i32 = arith.constant 0 : i32
    %c0_i32_0 = arith.constant 0 : i32
    %c0_i32_1 = arith.constant 0 : i32
    return %c0_i32, %c0_i32_0 : i32, i32
  }
  func.func @transform_4(%arg0: i32) -> i32 {
    %c0_i32 = arith.constant 0 : i32
    %c0_i32_0 = arith.constant 0 : i32
    return %c0_i32 : i32
  }
  func.func @transform_5(%arg0: i32) -> (i32, i32) {
    %c0_i32 = arith.constant 0 : i32
    %c0_i32_0 = arith.constant 0 : i32
    return %arg0, %c0_i32 : i32, i32
  }
}

</mosaic_0001>

<bundles_post_ra>
// kernel: tpu_custom_call.1
= control target key start
LH: loop header
LB: loop body
LE: loop exit
PB: predicated region body
PF: predicated region fallthrough
CT: control target
= control target key end

     0   :  { %11 = vsyncpa [#allocation4], 0  ;;  %s216_s0 = inlined_call_operand.hbm [shape: f32[8,32], index: 0, kind: input, shape index: {}]   ;;  %s217_s1 = inlined_call_operand.hbm [shape: f32[32,64], index: 1, kind: input, shape index: {}]   ;;  %s218_s2 = inlined_call_operand.vmem [shape: f32[1,64], index: 2, kind: input, shape index: {}]   ;;  %s219_s3 = inlined_call_operand.vmem [shape: f32[1,64], index: 3, kind: input, shape index: {}]   ;;  %s220_s4 = inlined_call_operand.<no memory space> [shape: f32[1], index: 4, kind: input, shape index: {}]   ;;  %s221_s5 = inlined_call_operand.vmem [shape: f32[8,1], index: 5, kind: output, shape index: {}]  }
   0x1   :  { %s18_s20 = sshll.u32 %s216_s0, 4  ;;  %s19_s20 = int_to_ptr.hbm [resolvable:$true] %s18_s20 }
   0x2   :  { %12 = vsyncpa [#allocation6], 0  ;;  %s164_s21 = smov [#allocation3]   ;;  %s28_s25 = sshll.u32 %s217_s1, 4  ;;  %s29_s25 = int_to_ptr.hbm [resolvable:$true] %s28_s25 }
   0x3   :  { %s20_s22 = sshll.u32 %s164_s21, 4  ;;  %s165_s26 = smov [#allocation5]   ;;  %s21_s22 = int_to_ptr.vmem [resolvable:$true] %s20_s22 }
   0x4   :  { %23 = dma.hbm_to_vmem [thread:$0]  %s19_s20, 128, %s21_s22, [#allocation4]  }
   0x5   :  { %s30_s27 = sshll.u32 %s165_s26, 4  ;;  %s166_s28 = smov 128   ;;  %s31_s27 = int_to_ptr.vmem [resolvable:$true] %s30_s27 }
   0x6   :  { %s167_s29 = smov 8  }
   0x7   :  { %36 = dma.hbm_to_vmem [thread:$0]  %s29_s25, 512, %s31_s27, [#allocation6], %s166_s28, %s166_s28, %s167_s29  }
   0x8   :  { %160 = dma.done.wait [#allocation4], 128  }
   0x9   :  { %161 = vsyncadd [#allocation4], 4294967168 }
   0xa   :  { %162 = dma.done.wait [#allocation6], 512  }
   0xb   :  { %163 = vsyncadd [#allocation6], 4294966784  ;;  %v55_v0 = vld [vmem:[#allocation5 + $0x18] sm:$0xff]  ;;  %v54_v1 = vld [vmem:[#allocation5 + $0x10] sm:$0xff]  ;;  %vm60_vm0 = vcmask 261120   ;;  %vm90_vm1 = vcmask 523264   ;;  %v95_v12 = vstv %s220_s4 }
   0xc   :  { %76 = vmatpush.msra.mxu0 %v55_v0  ;;  %v53_v2 = vld [vmem:[#allocation5 + $0x8] sm:$0xff]  ;;  %v52_v3 = vld [vmem:[#allocation5] sm:$0xff]  ;;  %v51_v4 = vld [vmem:[#allocation3] sm:$0xff]  ;;  %vm97_vm2 = vcmask 7168  }
   0xd   :  { %v110_v5 = vld [vmem:[%s218_s2] ss:$0 sm:$0xff] }
   0xe   :  { %77 = vmatpush.msra.mxu0 %v54_v1  ;;  %v111_v8 = vld [vmem:[%s219_s3] ss:$0 sm:$0xff] }
  0x10   :  { %78 = vmatpush.msra.mxu0 %v53_v2 }
  0x12   :  { %79 = vmatpush.msra.mxu0 %v52_v3 }
  0x13   :  { %105 = vmatmul.msk.f32.vlgmr.msra.gmra.mxu0 %vm60_vm0, %v51_v4 }
  0x90   :  { %v81_v6 = vpop.f32.mrf.mxu0 }
  0x91   :  { %v82_v7 = vadd.f32 %v110_v5, %v81_v6 }
  0x93   :  { %v84_v9 = vmax.f32 %v82_v7, 0.0 }
  0x95   :  { %v89_v10 = vmul.f32 %v111_v8, %v84_v9 }
  0x97   :  { %v91_v11 = vsel %vm90_vm1, %v89_v10, 0.0 }
  0x98   :  { %92 = vadd.xlane.f32.xlu0 %v91_v11 }
 0x10b   :  { %v93_v13 = vpop.xlane.xlu0 %92 }
 0x10c   :  { %v96_v14 = vadd.f32 %v95_v12, %v93_v13 }
 0x10e   :  { %98 = vst.msk [vmem:[%s221_s5] sm:$0xff] %vm97_vm2, %v96_v14 }
 0x10f   :  { %103 = vsyncpa [#allocation4], 1 }
 0x110   :  { %104 = vsyncpa [#allocation6], 1 }

</bundles_post_ra>
